<compile_context>
chip_gen: v7x
topology: tpu7x:2x2x1
jax: 0.10.0
libtpu: 0.0.40
codegen_flags: <defaults>
</compile_context>

<pallas_src>
import functools

import jax
import jax.numpy as jnp
from jax.experimental import pallas as pl
from jax.experimental.pallas import tpu as pltpu

raw_text = ('We are about to study the idea of a computational process.\n'
            'Computational processes are abstract beings that inhabit computers.\n'
            'As they evolve, processes manipulate other abstract things called data.\n'
            'The evolution of a process is directed by a pattern of rules\n'
            'called a program. People create programs to direct processes. In effect,\n'
            'we conjure the spirits of the computer with our spells.').split()

vocab = sorted(set(raw_text))
VOCAB_SIZE = len(vocab)

EMBED_DIM = 32        # embedding_dim
HIDDEN = 128          # proj output features
CONTEXT = 4           # CBOW context window (2 left + 2 right)
VOCAB_PAD = 128       # vocab axis padded to lane width (>= VOCAB_SIZE)
TM = 128              # batch tile: rows per grid step (sublane-dense output)


def cbow_kernel(idx_ref, emb_ref, w1_ref, b1_ref, w2_ref, b2_ref, out_ref):
    # idx_ref: (TM, CONTEXT) int32   emb_ref: (VOCAB_PAD, EMBED_DIM) bf16
    # w1_ref : (EMBED_DIM, HIDDEN) bf16   b1_ref: (1, HIDDEN) f32
    # w2_ref : (HIDDEN, VOCAB_PAD) bf16   b2_ref: (1, VOCAB_PAD) f32
    vocab_lane = jax.lax.broadcasted_iota(jnp.int32, (TM, VOCAB_PAD), 1)

    # Fused embedding gather + context sum as a one-hot-count matmul (MXU):
    #   counts[t, v] = #{c : idx[t, c] == v};   x = counts @ emb_table
    counts = jnp.zeros((TM, VOCAB_PAD), jnp.float32)
    for c in range(CONTEXT):  # CONTEXT is tiny -> unrolled VPU compares
        counts = counts + (vocab_lane == idx_ref[:, c:c + 1]).astype(jnp.float32)
    x = jnp.dot(counts.astype(emb_ref.dtype), emb_ref[...],
                preferred_element_type=jnp.float32)                 # (TM, D)

    # relu(proj(x))
    h = jnp.dot(x.astype(w1_ref.dtype), w1_ref[...],
                preferred_element_type=jnp.float32) + b1_ref[...]
    h = jnp.maximum(h, 0.0)                                         # (TM, 128)

    # output(h)
    logits = jnp.dot(h.astype(w2_ref.dtype), w2_ref[...],
                     preferred_element_type=jnp.float32) + b2_ref[...]

    # mask padded vocab lanes (finite large-negative in f32 -> exp() == 0, no NaN)
    logits = jnp.where(vocab_lane < VOCAB_SIZE, logits, -1e30)

    # log_softmax along the vocab axis
    m = jnp.max(logits, axis=-1, keepdims=True)
    s = logits - m
    lse = jnp.log(jnp.sum(jnp.exp(s), axis=-1, keepdims=True))
    out_ref[...] = s - lse


@jax.jit
def cbow_forward_batched(idx, emb_pad, w1, b1, w2, b2):
    """idx: (B, CONTEXT) int32 with B % TM == 0  ->  (B, VOCAB_SIZE) log-probs."""
    B = idx.shape[0]
    out_pad = pl.pallas_call(
        cbow_kernel,
        out_shape=jax.ShapeDtypeStruct((B, VOCAB_PAD), jnp.float32),
        grid_spec=pltpu.PrefetchScalarGridSpec(
            num_scalar_prefetch=0,
            grid=(B // TM,),
            in_specs=[
                pl.BlockSpec((TM, CONTEXT), lambda i: (i, 0)),          # per-tile indices
                pl.BlockSpec((VOCAB_PAD, EMBED_DIM), lambda i: (0, 0)),  # VMEM-resident
                pl.BlockSpec((EMBED_DIM, HIDDEN), lambda i: (0, 0)),     # VMEM-resident
                pl.BlockSpec((1, HIDDEN), lambda i: (0, 0)),
                pl.BlockSpec((HIDDEN, VOCAB_PAD), lambda i: (0, 0)),     # VMEM-resident
                pl.BlockSpec((1, VOCAB_PAD), lambda i: (0, 0)),
            ],
            out_specs=pl.BlockSpec((TM, VOCAB_PAD), lambda i: (i, 0)),
        ),
        compiler_params=pltpu.CompilerParams(
            dimension_semantics=("parallel",)),
    )(idx, emb_pad, w1, b1, w2, b2)
    return out_pad[:, :VOCAB_SIZE]


def cbow_forward(inputs, emb_pad, w1, b1, w2, b2):
    """Single-example forward matching the PyTorch module: (CONTEXT,) -> (1, vocab)."""
    idx = jnp.zeros((TM, CONTEXT), jnp.int32).at[0].set(inputs)
    return cbow_forward_batched(idx, emb_pad, w1, b1, w2, b2)[:1]


def cbow_reference(idx, emb_pad, w1, b1, w2, b2):
    """Pure-JAX reference mirroring the kernel's dtype choices."""
    x = jnp.sum(emb_pad[idx].astype(jnp.float32), axis=1)          # (B, D)
    h = jnp.dot(x.astype(jnp.bfloat16), w1,
                preferred_element_type=jnp.float32) + b1
    h = jnp.maximum(h, 0.0)
    logits = jnp.dot(h.astype(jnp.bfloat16), w2,
                     preferred_element_type=jnp.float32) + b2
    logits = logits[:, :VOCAB_SIZE]
    return jax.nn.log_softmax(logits, axis=-1)


def init_params(key):
    k_emb, k_w1, k_b1, k_w2, k_b2 = jax.random.split(key, 5)
    emb = jax.random.normal(k_emb, (VOCAB_SIZE, EMBED_DIM), jnp.float32)
    w1 = jax.random.normal(k_w1, (EMBED_DIM, HIDDEN), jnp.float32) * 0.1
    b1 = jax.random.normal(k_b1, (1, HIDDEN), jnp.float32) * 0.1
    w2 = jax.random.normal(k_w2, (HIDDEN, VOCAB_SIZE), jnp.float32) * 0.1
    b2 = jax.random.normal(k_b2, (1, VOCAB_SIZE), jnp.float32) * 0.1
    # pad vocab axes to 128 lanes; weights in bf16 (f32 MXU accumulation),
    # biases stay f32 (padded logits handled by the in-kernel lane mask).
    emb_pad = jnp.zeros((VOCAB_PAD, EMBED_DIM), jnp.float32).at[:VOCAB_SIZE].set(emb)
    w2_pad = jnp.zeros((HIDDEN, VOCAB_PAD), jnp.float32).at[:, :VOCAB_SIZE].set(w2)
    b2_pad = jnp.zeros((1, VOCAB_PAD), jnp.float32).at[:, :VOCAB_SIZE].set(b2)
    return (emb_pad.astype(jnp.bfloat16), w1.astype(jnp.bfloat16), b1,
            w2_pad.astype(jnp.bfloat16), b2_pad)


if __name__ == "__main__":
    key = jax.random.PRNGKey(0)
    k_params, k_inp = jax.random.split(key)
    params = init_params(k_params)

    B = 256  # two 128-row batch tiles -> grid = (2,)
    idx = jax.random.randint(k_inp, (B, CONTEXT), 0, VOCAB_SIZE, dtype=jnp.int32)

    out = cbow_forward_batched(idx, *params)
    out = jax.block_until_ready(out)

    assert out.shape == (B, VOCAB_SIZE)
    assert bool(jnp.all(jnp.isfinite(out)))
    # log_softmax sanity: probabilities sum to ~1 per example
    assert bool(jnp.all(jnp.abs(jnp.sum(jnp.exp(out), axis=-1) - 1.0) < 1e-3))

    ref = cbow_reference(idx, *params)
    assert bool(jnp.allclose(out, ref, atol=2e-2, rtol=2e-2))

    # single-example path matching the PyTorch module's forward(inputs)
    single = cbow_forward(idx[0], *params)
    single = jax.block_until_ready(single)
    assert single.shape == (1, VOCAB_SIZE)
    assert bool(jnp.allclose(single, ref[:1], atol=2e-2, rtol=2e-2))

    print("KERNEL_OK")
</pallas_src>

<mosaic_0001>
module attributes {stable_mosaic.version = 11 : i64} {
  func.func @cbow_kernel(%arg0: i32, %arg1: memref<128x4xi32, #tpu.memory_space<vmem>>, %arg2: memref<128x32xbf16, #tpu.memory_space<vmem>>, %arg3: memref<32x128xbf16, #tpu.memory_space<vmem>>, %arg4: memref<1x128xf32, #tpu.memory_space<vmem>>, %arg5: memref<128x128xbf16, #tpu.memory_space<vmem>>, %arg6: memref<1x128xf32, #tpu.memory_space<vmem>>, %arg7: memref<128x128xf32, #tpu.memory_space<vmem>>) attributes {dimension_semantics = [#tpu.dimension_semantics<parallel>], iteration_bounds = array<i64: 2>, scalar_prefetch = 0 : i64, scratch_operands = 0 : i64, tpu.core_type = #tpu.core_type<tc>, window_params = [{transform_indices = @transform_0, window_bounds = array<i64: 128, 4>}, {pipeline_mode = #tpu.pipeline_mode<synchronous>, transform_indices = @transform_1, window_bounds = array<i64: 128, 32>}, {pipeline_mode = #tpu.pipeline_mode<synchronous>, transform_indices = @transform_2, window_bounds = array<i64: 32, 128>}, {pipeline_mode = #tpu.pipeline_mode<synchronous>, transform_indices = @transform_3, window_bounds = array<i64: 1, 128>}, {pipeline_mode = #tpu.pipeline_mode<synchronous>, transform_indices = @transform_4, window_bounds = array<i64: 128, 128>}, {pipeline_mode = #tpu.pipeline_mode<synchronous>, transform_indices = @transform_5, window_bounds = array<i64: 1, 128>}, {transform_indices = @transform_6, window_bounds = array<i64: 128, 128>}]} {
    %0 = tpu.iota {dimensions = array<i32: 1>} : vector<128x128xi32>
    %cst = arith.constant 0.000000e+00 : f32
    %1 = vector.broadcast %cst : f32 to vector<128x128xf32>
    %c0 = arith.constant 0 : index
    %c0_0 = arith.constant 0 : index
    %2 = vector.load %arg1[%c0, %c0_0] : memref<128x4xi32, #tpu.memory_space<vmem>>, vector<128x1xi32>
    %3 = vector.broadcast %2 : vector<128x1xi32> to vector<128x128xi32>
    %4 = arith.cmpi eq, %0, %3 : vector<128x128xi32>
    %5 = arith.extui %4 : vector<128x128xi1> to vector<128x128xi32>
    %6 = arith.sitofp %5 : vector<128x128xi32> to vector<128x128xf32>
    %7 = arith.addf %1, %6 : vector<128x128xf32>
    %c0_1 = arith.constant 0 : index
    %c1 = arith.constant 1 : index
    %8 = vector.load %arg1[%c0_1, %c1] : memref<128x4xi32, #tpu.memory_space<vmem>>, vector<128x1xi32>
    %9 = vector.broadcast %8 : vector<128x1xi32> to vector<128x128xi32>
    %10 = arith.cmpi eq, %0, %9 : vector<128x128xi32>
    %11 = arith.extui %10 : vector<128x128xi1> to vector<128x128xi32>
    %12 = arith.sitofp %11 : vector<128x128xi32> to vector<128x128xf32>
    %13 = arith.addf %7, %12 : vector<128x128xf32>
    %c0_2 = arith.constant 0 : index
    %c2 = arith.constant 2 : index
    %14 = vector.load %arg1[%c0_2, %c2] : memref<128x4xi32, #tpu.memory_space<vmem>>, vector<128x1xi32>
    %15 = vector.broadcast %14 : vector<128x1xi32> to vector<128x128xi32>
    %16 = arith.cmpi eq, %0, %15 : vector<128x128xi32>
    %17 = arith.extui %16 : vector<128x128xi1> to vector<128x128xi32>
    %18 = arith.sitofp %17 : vector<128x128xi32> to vector<128x128xf32>
    %19 = arith.addf %13, %18 : vector<128x128xf32>
    %c0_3 = arith.constant 0 : index
    %c3 = arith.constant 3 : index
    %20 = vector.load %arg1[%c0_3, %c3] : memref<128x4xi32, #tpu.memory_space<vmem>>, vector<128x1xi32>
    %21 = vector.broadcast %20 : vector<128x1xi32> to vector<128x128xi32>
    %22 = arith.cmpi eq, %0, %21 : vector<128x128xi32>
    %23 = arith.extui %22 : vector<128x128xi1> to vector<128x128xi32>
    %24 = arith.sitofp %23 : vector<128x128xi32> to vector<128x128xf32>
    %25 = arith.addf %19, %24 : vector<128x128xf32>
    %26 = arith.truncf %25 : vector<128x128xf32> to vector<128x128xbf16>
    %c0_4 = arith.constant 0 : index
    %c0_5 = arith.constant 0 : index
    %27 = vector.load %arg2[%c0_4, %c0_5] : memref<128x32xbf16, #tpu.memory_space<vmem>>, vector<128x32xbf16>
    %cst_6 = arith.constant dense<0.000000e+00> : vector<128x32xf32>
    %28 = tpu.matmul %26, %27, %cst_6 {dimension_numbers = #tpu.dot_dimension_numbers<[1], [0], [0], [1], [0, 0, 1, 1], [], []>} : vector<128x128xbf16>, vector<128x32xbf16>, vector<128x32xf32> -> vector<128x32xf32>
    %29 = arith.truncf %28 : vector<128x32xf32> to vector<128x32xbf16>
    %c0_7 = arith.constant 0 : index
    %c0_8 = arith.constant 0 : index
    %30 = vector.load %arg3[%c0_7, %c0_8] : memref<32x128xbf16, #tpu.memory_space<vmem>>, vector<32x128xbf16>
    %cst_9 = arith.constant dense<0.000000e+00> : vector<128x128xf32>
    %31 = tpu.matmul %29, %30, %cst_9 {dimension_numbers = #tpu.dot_dimension_numbers<[1], [0], [0], [1], [0, 0, 1, 1], [], []>} : vector<128x32xbf16>, vector<32x128xbf16>, vector<128x128xf32> -> vector<128x128xf32>
    %c0_10 = arith.constant 0 : index
    %c0_11 = arith.constant 0 : index
    %32 = vector.load %arg4[%c0_10, %c0_11] : memref<1x128xf32, #tpu.memory_space<vmem>>, vector<1x128xf32>
    %33 = vector.broadcast %32 : vector<1x128xf32> to vector<128x128xf32>
    %34 = arith.addf %31, %33 : vector<128x128xf32>
    %cst_12 = arith.constant 0.000000e+00 : f32
    %35 = vector.broadcast %cst_12 : f32 to vector<128x128xf32>
    %36 = arith.maximumf %34, %35 : vector<128x128xf32>
    %37 = arith.truncf %36 : vector<128x128xf32> to vector<128x128xbf16>
    %c0_13 = arith.constant 0 : index
    %c0_14 = arith.constant 0 : index
    %38 = vector.load %arg5[%c0_13, %c0_14] : memref<128x128xbf16, #tpu.memory_space<vmem>>, vector<128x128xbf16>
    %cst_15 = arith.constant dense<0.000000e+00> : vector<128x128xf32>
    %39 = tpu.matmul %37, %38, %cst_15 {dimension_numbers = #tpu.dot_dimension_numbers<[1], [0], [0], [1], [0, 0, 1, 1], [], []>} : vector<128x128xbf16>, vector<128x128xbf16>, vector<128x128xf32> -> vector<128x128xf32>
    %c0_16 = arith.constant 0 : index
    %c0_17 = arith.constant 0 : index
    %40 = vector.load %arg6[%c0_16, %c0_17] : memref<1x128xf32, #tpu.memory_space<vmem>>, vector<1x128xf32>
    %41 = vector.broadcast %40 : vector<1x128xf32> to vector<128x128xf32>
    %42 = arith.addf %39, %41 : vector<128x128xf32>
    %c49_i32 = arith.constant 49 : i32
    %43 = vector.broadcast %c49_i32 : i32 to vector<128x128xi32>
    %44 = arith.cmpi slt, %0, %43 : vector<128x128xi32>
    %cst_18 = arith.constant -1.000000e+30 : f32
    %45 = vector.broadcast %cst_18 : f32 to vector<128x128xf32>
    %46 = arith.select %44, %42, %45 : vector<128x128xi1>, vector<128x128xf32>
    %cst_19 = arith.constant dense<0xFF800000> : vector<128xf32>
    %47 = vector.multi_reduction <maximumf>, %46, %cst_19 [1] : vector<128x128xf32> to vector<128xf32>
    %48 = vector.shape_cast %47 : vector<128xf32> to vector<128x1xf32>
    %49 = vector.broadcast %48 : vector<128x1xf32> to vector<128x128xf32>
    %50 = arith.subf %46, %49 : vector<128x128xf32>
    %51 = math.exp %50 : vector<128x128xf32>
    %cst_20 = arith.constant dense<0.000000e+00> : vector<128xf32>
    %52 = vector.multi_reduction <add>, %51, %cst_20 [1] : vector<128x128xf32> to vector<128xf32>
    %53 = vector.shape_cast %52 : vector<128xf32> to vector<128x1xf32>
    %54 = math.log %53 : vector<128x1xf32>
    %55 = vector.broadcast %54 : vector<128x1xf32> to vector<128x128xf32>
    %56 = arith.subf %50, %55 : vector<128x128xf32>
    %c0_21 = arith.constant 0 : index
    %c0_22 = arith.constant 0 : index
    %57 = vector.load %arg7[%c0_21, %c0_22] : memref<128x128xf32, #tpu.memory_space<vmem>>, vector<128x128xf32>
    tpu.vector_store %arg7[%c0_21, %c0_22], %56 {strides = array<i32>} : memref<128x128xf32, #tpu.memory_space<vmem>>, vector<128x128xf32>,
    return
  }
  func.func @transform_0(%arg0: i32) -> (i32, i32) {
    %c0_i32 = arith.constant 0 : i32
    %c0_i32_0 = arith.constant 0 : i32
    return %arg0, %c0_i32 : i32, i32
  }
  func.func @transform_1(%arg0: i32) -> (i32, i32) {
    %c0_i32 = arith.constant 0 : i32
    %c0_i32_0 = arith.constant 0 : i32
    %c0_i32_1 = arith.constant 0 : i32
    return %c0_i32, %c0_i32_0 : i32, i32
  }
  func.func @transform_2(%arg0: i32) -> (i32, i32) {
    %c0_i32 = arith.constant 0 : i32
    %c0_i32_0 = arith.constant 0 : i32
    %c0_i32_1 = arith.constant 0 : i32
    return %c0_i32, %c0_i32_0 : i32, i32
  }
  func.func @transform_3(%arg0: i32) -> (i32, i32) {
    %c0_i32 = arith.constant 0 : i32
    %c0_i32_0 = arith.constant 0 : i32
    %c0_i32_1 = arith.constant 0 : i32
    return %c0_i32, %c0_i32_0 : i32, i32
  }
  func.func @transform_4(%arg0: i32) -> (i32, i32) {
    %c0_i32 = arith.constant 0 : i32
    %c0_i32_0 = arith.constant 0 : i32
    %c0_i32_1 = arith.constant 0 : i32
    return %c0_i32, %c0_i32_0 : i32, i32
  }
  func.func @transform_5(%arg0: i32) -> (i32, i32) {
    %c0_i32 = arith.constant 0 : i32
    %c0_i32_0 = arith.constant 0 : i32
    %c0_i32_1 = arith.constant 0 : i32
    return %c0_i32, %c0_i32_0 : i32, i32
  }
  func.func @transform_6(%arg0: i32) -> (i32, i32) {
    %c0_i32 = arith.constant 0 : i32
    %c0_i32_0 = arith.constant 0 : i32
    return %arg0, %c0_i32 : i32, i32
  }
}

</mosaic_0001>

<bundles_post_ra>
// kernel: cbow_forward_batched.1
= control target key start
LH: loop header
LB: loop body
LE: loop exit
PB: predicated region body
PF: predicated region fallthrough
CT: control target
= control target key end

     0   :  { %s1884_s21 = smov 0   ;;  %s2430_s0 = inlined_call_operand.vmem [shape: s32[256,4], index: 0, kind: input, shape index: {}]   ;;  %s2431_s1 = inlined_call_operand.vmem [shape: bf16[128,32], index: 1, kind: input, shape index: {}]   ;;  %s2432_s2 = inlined_call_operand.vmem [shape: bf16[32,128], index: 2, kind: input, shape index: {}]   ;;  %s2433_s3 = inlined_call_operand.vmem [shape: f32[1,128], index: 3, kind: input, shape index: {}]   ;;  %s2434_s4 = inlined_call_operand.vmem [shape: bf16[128,128], index: 4, kind: input, shape index: {}]   ;;  %s2435_s5 = inlined_call_operand.vmem [shape: f32[1,128], index: 5, kind: input, shape index: {}]   ;;  %s2436_s6 = inlined_call_operand.vmem [shape: f32[256,128], index: 6, kind: output, shape index: {}]  }
   0x1 LB: > { %s1485_s22 = sadd.s32 4294967295, %s1842_s21   ;;  %p1489_p0 = scmp.ge.s32.totalorder %s1842_s21, 1  ;;  %s1842_s21 = sphi %s1884_s21, %s16_s21  }
   0x2   : > { %p213_p1 = scmp.lt.s32.totalorder %s1842_s21, 3 }
   0x4   : > { %p214_p2 = pnand %p1489_p0, %p213_p1 }
   0x5   : > { %s1490_s23 = sshll.u32 (!%p214_p2), %s1485_s22, 4  ;;  %v1844_v0 = vmov (!%p214_p2), 1   ;;  %v1845_v1 = vmov (!%p214_p2), 0   ;;  %v1846_v9 = vmov (!%p214_p2), 2   ;;  %v1847_v13 = vmov (!%p214_p2), 3   ;;  %v1754_v15 = vld [vmem:[%s2431_s1] sm:$0xff] (!%p214_p2)  }
   0x6   : > { %217 = sbr.rel (%p214_p2) target bundleno = 1302 (0x516), region = 44  ;;  %1728 = vset.pattern.permute.xlu1 (!%p214_p2), %v1844_v0  ;;  %1727 = vset.pattern.permute.xlu0 (!%p214_p2), %v1845_v1  ;;  %p244_p3 = scmp.lt.s32.totalorder (!%p214_p2), %s1490_s23, 31  ;;  %v1755_v16 = vld [vmem:[%s2431_s1 + $0x8] sm:$0xff] (!%p214_p2)   ;;  %v1756_v18 = vld [vmem:[%s2431_s1 + $0x10] sm:$0xff] (!%p214_p2)   ;;  %v1757_v19 = vld [vmem:[%s2431_s1 + $0x18] sm:$0xff] (!%p214_p2)   ;;  %v256_v45 = vlaneseq (!%p214_p2)  ;;  %v1848_v51 = vmov (!%p214_p2), 0.0  }
   0x7   : > { %1630 = vmatprep.subr.bf16.mxu0 (!%p214_p2), %v1754_v15  ;;  %v1758_v20 = vld [vmem:[%s2431_s1 + $0x20] sm:$0xff] (!%p214_p2)   ;;  %v1759_v21 = vld [vmem:[%s2431_s1 + $0x28] sm:$0xff] (!%p214_p2)   ;;  %v1760_v22 = vld [vmem:[%s2431_s1 + $0x30] sm:$0xff] (!%p214_p2)  }
   0x8   : > { %1631 = vmatpush3.bf16.msra.mxu0 (!%p214_p2), %v1754_v15  ;;  %v1761_v23 = vld [vmem:[%s2431_s1 + $0x38] sm:$0xff] (!%p214_p2)   ;;  %v2046_v48 = vand.u32 (!%p214_p2), 127, %v256_v45  ;;  %v1762_v62 = vld [vmem:[%s2432_s2] sm:$0xff] (!%p214_p2)  }
   0x9   : > { %1632 = vmatprep.subr.bf16.mxu0 (!%p214_p2), %v1755_v16  ;;  %1662 = vmatprep.subr.bf16.mxu1 (!%p214_p2), %v1762_v62 }
   0xa   : > { %1663 = vmatpush3.bf16.msra.mxu1 (!%p214_p2), %v1762_v62 }
   0xc   : > { %1633 = vmatpush3.bf16.msra.mxu0 (!%p214_p2), %v1755_v16 }
   0xd   : > { %s2438_s23 = smov (!%p244_p3, %s1490_s23), 31  ;;  %1634 = vmatprep.subr.bf16.mxu0 %v1756_v18 }
   0xe   : > { %s1491_s24 = sshll.u32 %s2438_s23, 3 }
   0xf   : > { %s1902_s27 = scalar_lea.vmem %s2430_s0, %s1491_s24  ;;  %s2393_s28 = scalar_lea.vmem %s2436_s6, %s1491_s24 }
  0x10   : > { %v1905_v2 = vld [vmem:[%s1902_s27] sm:$0xff]  ;;  %v259_v3 = vld [vmem:[%s1902_s27 + $0x8] sm:$0xff]  ;;  %v260_v4 = vld [vmem:[%s1902_s27 + $0x10] sm:$0xff]  ;;  %1635 = vmatpush3.bf16.msra.mxu0 %v1756_v18 }
  0x11   : > { %387 = vperm.xlu1 %1728, %v1905_v2   ;;  %275 = vperm.xlu0 %1727, %v1905_v2   ;;  %v1912_v5 = vld [vmem:[%s1902_s27 + $0x18] sm:$0xff]  ;;  %v1915_v6 = vld [vmem:[%s1902_s27 + $0x28] sm:$0xff]  ;;  %v1922_v7 = vld [vmem:[%s1902_s27 + $0x30] sm:$0xff] }
  0x12   : > { %v1927_v8 = vld [vmem:[%s1902_s27 + $0x48] sm:$0xff]  ;;  %v1933_v10 = vld [vmem:[%s1902_s27 + $0x50] sm:$0xff]  ;;  %v262_v14 = vld [vmem:[%s1902_s27 + $0x20] sm:$0xff]  ;;  %1636 = vmatprep.subr.bf16.mxu0 %v1757_v19 }
  0x13   : > { %v1937_v11 = vld [vmem:[%s1902_s27 + $0x68] sm:$0xff]  ;;  %v1942_v12 = vld [vmem:[%s1902_s27 + $0x70] sm:$0xff]  ;;  %v265_v17 = vld [vmem:[%s1902_s27 + $0x38] sm:$0xff] }
  0x14   : > { %1637 = vmatpush3.bf16.msra.mxu0 %v1757_v19  ;;  %v266_v24 = vld [vmem:[%s1902_s27 + $0x40] sm:$0xff]  ;;  %v269_v25 = vld [vmem:[%s1902_s27 + $0x58] sm:$0xff] }
  0x15   : > { %390 = vperm.xlu1 %1728, %v259_v3   ;;  %278 = vperm.xlu0 %1727, %v259_v3   ;;  %v270_v26 = vld [vmem:[%s1902_s27 + $0x60] sm:$0xff]  ;;  %v273_v27 = vld [vmem:[%s1902_s27 + $0x78] sm:$0xff] }
  0x16   : > { %1638 = vmatprep.subr.bf16.mxu0 %v1758_v20 }
  0x18   : > { %1639 = vmatpush3.bf16.msra.mxu0 %v1758_v20 }
  0x19   : > { %1729 = vset.pattern.permute.xlu1 %v1845_v1  ;;  %281 = vperm.xlu0 %1727, %v260_v4  }
  0x1a   : > { %284 = vperm.xlu1 %1729, %v1912_v5   ;;  %1640 = vmatprep.subr.bf16.mxu0 %v1759_v21 }
  0x1c   : > { %1641 = vmatpush3.bf16.msra.mxu0 %v1759_v21 }
  0x1d   : > { %290 = vperm.xlu0 %1727, %v1915_v6   ;;  %1642 = vmatprep.subr.bf16.mxu0 %v1760_v22 }
  0x1e   : > { %1730 = vset.pattern.permute.xlu1 %v1844_v0 }
  0x1f   : > { %396 = vperm.xlu1 %1730, %v1912_v5  }
  0x20   : > { %1643 = vmatpush3.bf16.msra.mxu0 %v1760_v22 }
  0x21   : > { %293 = vperm.xlu0 %1727, %v1922_v7   ;;  %1644 = vmatprep.subr.bf16.mxu0 %v1761_v23 }
  0x23   : > { %1731 = vset.pattern.permute.xlu1 %v1846_v9 }
  0x24   : > { %499 = vperm.xlu1 %1731, %v1905_v2   ;;  %1645 = vmatpush3.bf16.msra.mxu0 %v1761_v23 }
  0x25   : > { %302 = vperm.xlu0 %1727, %v1927_v8  }
  0x28   : > { %505 = vperm.xlu1 %1731, %v260_v4  }
  0x29   : > { %305 = vperm.xlu0 %1727, %v1933_v10  }
  0x2c   : > { %508 = vperm.xlu1 %1731, %v1912_v5  }
  0x2d   : > { %314 = vperm.xlu0 %1727, %v1937_v11  }
  0x30   : > { %1732 = vset.pattern.permute.xlu1 %v1847_v13 }
  0x31   : > { %614 = vperm.xlu1 %1732, %v259_v3   ;;  %317 = vperm.xlu0 %1727, %v1942_v12  }
  0x35   : > { %617 = vperm.xlu1 %1732, %v260_v4   ;;  %1747 = vset.pattern.permute.xlu0 %v1844_v0 }
  0x36   : > { %393 = vperm.xlu0 %1747, %v260_v4  }
  0x39   : > { %1733 = vset.pattern.permute.xlu1 %v1845_v1 }
  0x3a   : > { %287 = vperm.xlu1 %1733, %v262_v14   ;;  %405 = vperm.xlu0 %1747, %v1922_v7  }
  0x3e   : > { %1734 = vset.pattern.permute.xlu1 %v1844_v0  ;;  %417 = vperm.xlu0 %1747, %v1933_v10  }
  0x3f   : > { %399 = vperm.xlu1 %1734, %v262_v14  }
  0x42   : > { %429 = vperm.xlu0 %1747, %v1942_v12  }
  0x43   : > { %402 = vperm.xlu1 %1734, %v1915_v6  }
  0x46   : > { %1749 = vset.pattern.permute.xlu0 %v1846_v9 }
  0x47   : > { %1735 = vset.pattern.permute.xlu1 %v1845_v1  ;;  %502 = vperm.xlu0 %1749, %v259_v3  }
  0x48   : > { %296 = vperm.xlu1 %1735, %v265_v17  }
  0x4b   : > { %514 = vperm.xlu0 %1749, %v1915_v6  }
  0x4c   : > { %1736 = vset.pattern.permute.xlu1 %v1844_v0 }
  0x4d   : > { %408 = vperm.xlu1 %1736, %v265_v17  }
  0x4f   : > { %526 = vperm.xlu0 %1749, %v1927_v8  }
  0x51   : > { %1737 = vset.pattern.permute.xlu1 %v1846_v9 }
  0x52   : > { %511 = vperm.xlu1 %1737, %v262_v14  }
  0x53   : > { %538 = vperm.xlu0 %1749, %v1937_v11  }
  0x56   : > { %517 = vperm.xlu1 %1737, %v1922_v7  }
  0x57   : > { %1752 = vset.pattern.permute.xlu0 %v1847_v13 }
  0x58   : > { %611 = vperm.xlu0 %1752, %v1905_v2  }
  0x5a   : > { %520 = vperm.xlu1 %1737, %v265_v17  }
  0x5c   : > { %620 = vperm.xlu0 %1752, %v1912_v5  }
  0x5e   : > { %1738 = vset.pattern.permute.xlu1 %v1847_v13 }
  0x5f   : > { %626 = vperm.xlu1 %1738, %v1915_v6  }
  0x60   : > { %623 = vperm.xlu0 %1752, %v262_v14  }
  0x63   : > { %629 = vperm.xlu1 %1738, %v1922_v7  }
  0x64   : > { %632 = vperm.xlu0 %1752, %v265_v17  }
  0x67   : > { %1739 = vset.pattern.permute.xlu1 %v1845_v1 }
  0x68   : > { %299 = vperm.xlu1 %1739, %v266_v24   ;;  %635 = vperm.xlu0 %1752, %v266_v24  }
  0x6c   : > { %1740 = vset.pattern.permute.xlu1 %v1844_v0  ;;  %644 = vperm.xlu0 %1752, %v269_v25  }
  0x6d   : > { %411 = vperm.xlu1 %1740, %v266_v24  }
  0x70   : > { %647 = vperm.xlu0 %1752, %v270_v26  }
  0x71   : > { %414 = vperm.xlu1 %1740, %v1927_v8  }
  0x74   : > { %656 = vperm.xlu0 %1752, %v273_v27  }
  0x75   : > { %1741 = vset.pattern.permute.xlu1 %v1845_v1 }
  0x76   : > { %308 = vperm.xlu1 %1741, %v269_v25  }
  0x7a   : > { %1742 = vset.pattern.permute.xlu1 %v1844_v0 }
  0x7b   : > { %420 = vperm.xlu1 %1742, %v269_v25  }
  0x7f   : > { %1743 = vset.pattern.permute.xlu1 %v1846_v9 }
  0x80   : > { %523 = vperm.xlu1 %1743, %v266_v24  }
  0x84   : > { %529 = vperm.xlu1 %1743, %v1933_v10  }
  0x88   : > { %532 = vperm.xlu1 %1743, %v269_v25  }
  0x8c   : > { %1744 = vset.pattern.permute.xlu1 %v1847_v13 }
  0x8d   : > { %638 = vperm.xlu1 %1744, %v1927_v8  }
  0x90   : > { %v2006_v28 = vpop.permute.xlu1 %387  ;;  %v2008_v29 = vpop.permute.xlu0 %275 }
  0x91   : > { %641 = vperm.xlu1 %1744, %v1933_v10   ;;  %vm434_vm4 = vcmp.eq.s32.totalorder %v2046_v48, %v2006_v28  ;;  %vm322_vm5 = vcmp.eq.s32.totalorder %v2046_v48, %v2008_v29 }
  0x92   : > { %v1510_v4 = vsel %vm434_vm4, 1.0, %v1848_v51  ;;  %v1494_v5 = vsel %vm322_vm5, 1.0, %v1848_v51 }
  0x94   : > { %v2011_v30 = vpop.permute.xlu1 %390  ;;  %v2013_v31 = vpop.permute.xlu0 %278 }
  0x95   : > { %1745 = vset.pattern.permute.xlu1 %v1845_v1  ;;  %vm435_vm6 = vcmp.eq.s32.totalorder %v2046_v48, %v2011_v30  ;;  %vm323_vm7 = vcmp.eq.s32.totalorder %v2046_v48, %v2013_v31 }
  0x96   : > { %311 = vperm.xlu1 %1745, %v270_v26   ;;  %v1511_v6 = vsel %vm435_vm6, 1.0, %v1848_v51  ;;  %v1495_v7 = vsel %vm323_vm7, 1.0, %v1848_v51 }
  0x97   : > { %v483_v16 = vadd.f32 %v1511_v6, %v1495_v7 }
  0x98   : > { %v2016_v32 = vpop.permute.xlu0 %281 }
  0x99   : > { %v2018_v33 = vpop.permute.xlu1 %284  ;;  %vm324_vm8 = vcmp.eq.s32.totalorder %v2046_v48, %v2016_v32 }
  0x9a   : > { %1746 = vset.pattern.permute.xlu1 %v1844_v0  ;;  %vm325_vm13 = vcmp.eq.s32.totalorder %v2046_v48, %v2018_v33 }
  0x9b   : > { %423 = vperm.xlu1 %1746, %v270_v26   ;;  %v1497_v17 = vsel %vm325_vm13, 1.0, %v1848_v51 }
  0x9c   : > { %v2021_v34 = vpop.permute.xlu0 %290 }
  0x9d   : > { %vm327_vm14 = vcmp.eq.s32.totalorder %v2046_v48, %v2021_v34 }
  0x9e   : > { %v2023_v35 = vpop.permute.xlu1 %396  ;;  %v1499_v18 = vsel %vm327_vm14, 1.0, %v1848_v51 }
  0x9f   : > { %426 = vperm.xlu1 %1746, %v1937_v11   ;;  %vm437_vm9 = vcmp.eq.s32.totalorder %v2046_v48, %v2023_v35 }
  0xa0   : > { %v2026_v36 = vpop.permute.xlu0 %293  ;;  %v1513_v10 = vsel %vm437_vm9, 1.0, %v1848_v51 }
  0xa1   : > { %v485_v20 = vadd.f32 %v1513_v10, %v1497_v17 }
  0xa3   : > { %1748 = vset.pattern.permute.xlu1 %v1845_v1  ;;  %v2029_v37 = vpop.permute.xlu1 %499 }
  0xa4   : > { %320 = vperm.xlu1 %1748, %v273_v27   ;;  %v2031_v38 = vpop.permute.xlu0 %302  ;;  %vm546_vm11 = vcmp.eq.s32.totalorder %v2046_v48, %v2029_v37 }
  0xa5   : > { %v1526_v14 = vsel %vm546_vm11, 1.0, %v1848_v51 }
  0xa7   : > { %v2033_v39 = vpop.permute.xlu1 %505 }
  0xa8   : > { %1750 = vset.pattern.permute.xlu1 %v1844_v0  ;;  %v306_v40 = vpop.permute.xlu0 %305 }
  0xa9   : > { %432 = vperm.xlu1 %1750, %v273_v27   ;;  %vm332_vm0 = vcmp.eq.s32.totalorder %v2046_v48, %v306_v40 }
  0xaa   : > { %v1504_v52 = vsel %vm332_vm0, 1.0, %v1848_v51  ;;  %vm328_vm0 = vcmp.eq.s32.totalorder %v2046_v48, %v2026_v36 }
  0xab   : > { %v2036_v41 = vpop.permute.xlu1 %508  ;;  %v1500_v21 = vsel %vm328_vm0, 1.0, %v1848_v51 }
  0xac   : > { %v2038_v42 = vpop.permute.xlu0 %314  ;;  %vm549_vm15 = vcmp.eq.s32.totalorder %v2046_v48, %v2036_v41 }
  0xad   : > { %1751 = vset.pattern.permute.xlu1 %v1846_v9  ;;  %v1496_v9 = vsel %vm324_vm8, 1.0, %v1848_v51  ;;  %v1529_v19 = vsel %vm549_vm15, 1.0, %v1848_v51 }
  0xae   : > { %535 = vperm.xlu1 %1751, %v270_v26  }
  0xb0   : > { %v2041_v43 = vpop.permute.xlu1 %614  ;;  %v318_v44 = vpop.permute.xlu0 %317 }
  0xb1   : > { %vm336_vm1 = vcmp.eq.s32.totalorder %v2046_v48, %v318_v44 }
  0xb2   : > { %541 = vperm.xlu1 %1751, %v1942_v12   ;;  %v1508_v57 = vsel %vm336_vm1, 1.0, %v1848_v51  ;;  %vm548_vm1 = vcmp.eq.s32.totalorder %v2046_v48, %v2033_v39 }
  0xb3   : > { %v1528_v25 = vsel %vm548_vm1, 1.0, %v1848_v51 }
  0xb4   : > { %v2044_v46 = vpop.permute.xlu1 %617 }
  0xb5   : > { %v394_v47 = vpop.permute.xlu0 %393  ;;  %vm660_vm4 = vcmp.eq.s32.totalorder %v2046_v48, %v2044_v46 }
  0xb6   : > { %544 = vperm.xlu1 %1751, %v273_v27   ;;  %vm436_vm10 = vcmp.eq.s32.totalorder %v2046_v48, %v394_v47  ;;  %v597_v27 = vadd.f32 %v1529_v19, %v485_v20  ;;  %v1544_v39 = vsel %vm660_vm4, 1.0, %v1848_v51 }
  0xb9   : > { %v2048_v49 = vpop.permute.xlu1 %287  ;;  %v2050_v50 = vpop.permute.xlu0 %405 }
  0xba   : > { %1753 = vset.pattern.permute.xlu1 %v1847_v13  ;;  %v482_v13 = vadd.f32 %v1510_v4, %v1494_v5  ;;  %vm326_vm7 = vcmp.eq.s32.totalorder %v2046_v48, %v2048_v49 }
  0xbb   : > { %650 = vperm.xlu1 %1753, %v1937_v11   ;;  %v1512_v11 = vsel %vm436_vm10, 1.0, %v1848_v51  ;;  %v1498_v40 = vsel %vm326_vm7, 1.0, %v1848_v51 }
  0xbc   : > { %v484_v22 = vadd.f32 %v1512_v11, %v1496_v9  ;;  %v594_v24 = vadd.f32 %v1526_v14, %v482_v13 }
  0xbd   : > { %v418_v53 = vpop.permute.xlu0 %417 }
  0xbe   : > { %v2057_v54 = vpop.permute.xlu1 %399  ;;  %vm444_vm2 = vcmp.eq.s32.totalorder %v2046_v48, %v418_v53  ;;  %v596_v31 = vadd.f32 %v1528_v25, %v484_v22 }
  0xbf   : > { %v1520_v55 = vsel %vm444_vm2, 1.0, %v1848_v51  ;;  %653 = vperm.xlu1 %1753, %v1942_v12   ;;  %vm440_vm2 = vcmp.eq.s32.totalorder %v2046_v48, %v2050_v50  ;;  %vm438_vm5 = vcmp.eq.s32.totalorder %v2046_v48, %v2057_v54 }
  0xc0   : > { %v2062_v56 = vadd.f32 %v1520_v55, %v1504_v52  ;;  %v1516_v29 = vsel %vm440_vm2, 1.0, %v1848_v51  ;;  %v1514_v34 = vsel %vm438_vm5, 1.0, %v1848_v51  ;;  %v708_v54 = vadd.f32 %v1544_v39, %v596_v31 }
  0xc1   : > { %v430_v58 = vpop.permute.xlu0 %429  ;;  %v488_v41 = vadd.f32 %v1516_v29, %v1500_v21  ;;  %v486_v49 = vadd.f32 %v1514_v34, %v1498_v40 }
  0xc2   : > { %v2065_v59 = vpop.permute.xlu1 %402  ;;  %vm448_vm3 = vcmp.eq.s32.totalorder %v2046_v48, %v430_v58 }
  0xc3   : > { %v1524_v60 = vsel %vm448_vm3, 1.0, %v1848_v51  ;;  %vm659_vm3 = vcmp.eq.s32.totalorder %v2046_v48, %v2041_v43  ;;  %vm439_vm6 = vcmp.eq.s32.totalorder %v2046_v48, %v2065_v59 }
  0xc4   : > { %v2069_v61 = vadd.f32 %v1524_v60, %v1508_v57  ;;  %v1543_v30 = vsel %vm659_vm3, 1.0, %v1848_v51  ;;  %v1515_v35 = vsel %vm439_vm6, 1.0, %v1848_v51  ;;  %vm331_vm6 = vcmp.eq.s32.totalorder %v2046_v48, %v2031_v38 }
  0xc5   : > { %v487_v50 = vadd.f32 %v1515_v35, %v1499_v18  ;;  %v1503_v29 = vsel %vm331_vm6, 1.0, %v1848_v51 }
  0xc6   : > { %v503_v63 = vpop.permute.xlu0 %502 }
  0xc7   : > { %v2074_v0 = vpop.permute.xlu1 %296  ;;  %vm547_vm12 = vcmp.eq.s32.totalorder %v2046_v48, %v503_v63 }
  0xc8   : > { %v1527_v15 = vsel %vm547_vm12, 1.0, %v1848_v51  ;;  %vm329_vm14 = vcmp.eq.s32.totalorder %v2046_v48, %v2074_v0 }
  0xc9   : > { %v595_v26 = vadd.f32 %v1527_v15, %v483_v16  ;;  %v1501_v0 = vsel %vm329_vm14, 1.0, %v1848_v51 }
  0xca   : > { %v2076_v1 = vpop.permute.xlu0 %514 }
  0xcb   : > { %vm551_vm8 = vcmp.eq.s32.totalorder %v2046_v48, %v2076_v1  ;;  %v707_v37 = vadd.f32 %v1543_v30, %v595_v26 }
  0xcc   : > { %v2080_v2 = vpop.permute.xlu1 %408  ;;  %v1531_v43 = vsel %vm551_vm8, 1.0, %v1848_v51 }
  0xcd   : > { %vm441_vm11 = vcmp.eq.s32.totalorder %v2046_v48, %v2080_v2  ;;  %v599_v55 = vadd.f32 %v1531_v43, %v487_v50 }
  0xce   : > { %v2088_v3 = vpop.permute.xlu0 %526  ;;  %v1517_v57 = vsel %vm441_vm11, 1.0, %v1848_v51 }
  0xcf   : > { %v489_v5 = vadd.f32 %v1517_v57, %v1501_v0 }
  0xd1   : > { %v512_v8 = vpop.permute.xlu1 %511 }
  0xd2   : > { %v2113_v12 = vpop.permute.xlu0 %538  ;;  %vm550_vm10 = vcmp.eq.s32.totalorder %v2046_v48, %v512_v8 }
  0xd3   : > { %v1530_v45 = vsel %vm550_vm10, 1.0, %v1848_v51 }
  0xd4   : > { %v598_v58 = vadd.f32 %v1530_v45, %v486_v49 }
  0xd5   : > { %v518_v23 = vpop.permute.xlu1 %517 }
  0xd6   : > { %vm552_vm13 = vcmp.eq.s32.totalorder %v2046_v48, %v518_v23 }
  0xd7   : > { %v612_v28 = vpop.permute.xlu0 %611  ;;  %v1532_v60 = vsel %vm552_vm13, 1.0, %v1848_v51 }
  0xd8   : > { %vm658_vm9 = vcmp.eq.s32.totalorder %v2046_v48, %v612_v28  ;;  %v600_v8 = vadd.f32 %v1532_v60, %v488_v41 }
  0xd9   : > { %v1542_v32 = vsel %vm658_vm9, 1.0, %v1848_v51  ;;  %v521_v33 = vpop.permute.xlu1 %520  ;;  %vm555_vm9 = vcmp.eq.s32.totalorder %v2046_v48, %v2088_v3 }
  0xda   : > { %v706_v36 = vadd.f32 %v1542_v32, %v594_v24  ;;  %vm553_vm15 = vcmp.eq.s32.totalorder %v2046_v48, %v521_v33  ;;  %v1535_v33 = vsel %vm555_vm9, 1.0, %v1848_v51 }
  0xdb   : > { %v621_v44 = vpop.permute.xlu0 %620  ;;  %v1533_v1 = vsel %vm553_vm15, 1.0, %v1848_v51 }
  0xdc   : > { %vm661_vm12 = vcmp.eq.s32.totalorder %v2046_v48, %v621_v44  ;;  %v722_v47 = vpack.c.bf16 %v707_v37, %v706_v36  ;;  %v601_v10 = vadd.f32 %v1533_v1, %v489_v5 }
  0xdd   : > { %v1545_v46 = vsel %vm661_vm12, 1.0, %v1848_v51 }
  0xde   : > { %v709_v52 = vadd.f32 %v1545_v46, %v597_v27  ;;  %v627_v53 = vpop.permute.xlu1 %626  ;;  %1646 = vmatprep.mubr.bf16.mxu0 %v722_v47 }
  0xdf   : > { %vm663_vm0 = vcmp.eq.s32.totalorder %v2046_v48, %v627_v53  ;;  %v624_v59 = vpop.permute.xlu0 %623 }
  0xe0   : > { %v1547_v62 = vsel %vm663_vm0, 1.0, %v1848_v51  ;;  %vm662_vm1 = vcmp.eq.s32.totalorder %v2046_v48, %v624_v59  ;;  %v723_v63 = vpack.c.bf16 %v709_v52, %v708_v54 }
  0xe1   : > { %v711_v2 = vadd.f32 %v1547_v62, %v599_v55  ;;  %v1546_v4 = vsel %vm662_vm1, 1.0, %v1848_v51 }
  0xe2   : > { %v710_v6 = vadd.f32 %v1546_v4, %v598_v58  ;;  %v630_v7 = vpop.permute.xlu1 %629  ;;  %1647 = vmatmul.mubr.bf16.vlgmr.msra.gmra.mrb[0].mxu0 %v723_v63 }
  0xe3   : > { %vm664_vm2 = vcmp.eq.s32.totalorder %v2046_v48, %v630_v7  ;;  %v633_v9 = vpop.permute.xlu0 %632 }
  0xe4   : > { %v1548_v11 = vsel %vm664_vm2, 1.0, %v1848_v51  ;;  %vm665_vm3 = vcmp.eq.s32.totalorder %v2046_v48, %v633_v9  ;;  %v724_v13 = vpack.c.bf16 %v711_v2, %v710_v6  ;;  %vm335_vm2 = vcmp.eq.s32.totalorder %v2046_v48, %v2038_v42 }
  0xe5   : > { %v712_v14 = vadd.f32 %v1548_v11, %v600_v8  ;;  %v1549_v15 = vsel %vm665_vm3, 1.0, %v1848_v51  ;;  %vm559_vm3 = vcmp.eq.s32.totalorder %v2046_v48, %v2113_v12 }
  0xe6   : > { %v713_v16 = vadd.f32 %v1549_v15, %v601_v10  ;;  %1650 = vmatprep.mubr.bf16.mxu0 %v724_v13  ;;  %v1539_v2 = vsel %vm559_vm3, 1.0, %v1848_v51  ;;  %v1763_v13 = vld [vmem:[%s2432_s2 + $0x8] sm:$0xff]  }
  0xe7   : > { %v300_v17 = vpop.permute.xlu1 %299  ;;  %v636_v25 = vpop.permute.xlu0 %635  ;;  %1664 = vmatprep.subr.bf16.mxu1 %v1763_v13 }
  0xe8   : > { %v725_v18 = vpack.c.bf16 %v713_v16, %v712_v14  ;;  %vm330_vm7 = vcmp.eq.s32.totalorder %v2046_v48, %v300_v17  ;;  %vm666_vm11 = vcmp.eq.s32.totalorder %v2046_v48, %v636_v25  ;;  %1665 = vmatpush3.bf16.msra.mxu1 %v1763_v13 }
  0xe9   : > { %v1502_v30 = vsel %vm330_vm7, 1.0, %v1848_v51  ;;  %v1550_v37 = vsel %vm666_vm11, 1.0, %v1848_v51 }
  0xea   : > { %1651 = vmatmul.mubr.bf16.gmra.mrb[4].mxu0 %v725_v18 }
  0xeb   : > { %v645_v34 = vpop.permute.xlu0 %644 }
  0xec   : > { %v412_v19 = vpop.permute.xlu1 %411  ;;  %vm669_vm15 = vcmp.eq.s32.totalorder %v2046_v48, %v645_v34  ;;  %v1764_v34 = vld [vmem:[%s2434_s4] sm:$0xff]  }
  0xed   : > { %vm442_vm4 = vcmp.eq.s32.totalorder %v2046_v48, %v412_v19  ;;  %v1553_v46 = vsel %vm669_vm15, 1.0, %v1848_v51  ;;  %1682 = vmatprep.subr.bf16.mxu1 %v1764_v34 }
  0xee   : > { %v1518_v26 = vsel %vm442_vm4, 1.0, %v1848_v51 }
  0xef   : > { %v490_v31 = vadd.f32 %v1518_v26, %v1502_v30  ;;  %v648_v8 = vpop.permute.xlu0 %647 }
  0xf0   : > { %v415_v20 = vpop.permute.xlu1 %414  ;;  %vm670_vm11 = vcmp.eq.s32.totalorder %v2046_v48, %v648_v8 }
  0xf1   : > { %vm443_vm5 = vcmp.eq.s32.totalorder %v2046_v48, %v415_v20 }
  0xf2   : > { %v1519_v27 = vsel %vm443_vm5, 1.0, %v1848_v51 }
  0xf3   : > { %v491_v32 = vadd.f32 %v1519_v27, %v1503_v29  ;;  %v657_v17 = vpop.permute.xlu0 %656 }
  0xf5   : > { %v309_v21 = vpop.permute.xlu1 %308  ;;  %v603_v43 = vadd.f32 %v1535_v33, %v491_v32 }
  0xf6   : > { %vm333_vm12 = vcmp.eq.s32.totalorder %v2046_v48, %v309_v21 }
  0xf7   : > { %v1505_v36 = vsel %vm333_vm12, 1.0, %v1848_v51 }
  0xfa   : > { %v421_v22 = vpop.permute.xlu1 %420 }
  0xfb   : > { %vm445_vm10 = vcmp.eq.s32.totalorder %v2046_v48, %v421_v22  ;;  %v1554_v22 = vsel %vm670_vm11, 1.0, %v1848_v51 }
  0xfc   : > { %v1521_v3 = vsel %vm445_vm10, 1.0, %v1848_v51 }
  0xfd   : > { %v493_v41 = vadd.f32 %v1521_v3, %v1505_v36 }
  0xff   : > { %v524_v23 = vpop.permute.xlu1 %523 }
 0x100   : > { %vm554_vm8 = vcmp.eq.s32.totalorder %v2046_v48, %v524_v23 }
 0x101   : > { %v1534_v38 = vsel %vm554_vm8, 1.0, %v1848_v51 }
 0x102   : > { %v602_v35 = vadd.f32 %v1534_v38, %v490_v31 }
 0x103   : > { %v530_v24 = vpop.permute.xlu1 %529 }
 0x104   : > { %vm556_vm14 = vcmp.eq.s32.totalorder %v2046_v48, %v530_v24  ;;  %v714_v47 = vadd.f32 %v1550_v37, %v602_v35 }
 0x105   : > { %v1536_v44 = vsel %vm556_vm14, 1.0, %v1848_v51  ;;  %vm673_vm14 = vcmp.eq.s32.totalorder %v2046_v48, %v657_v17 }
 0x106   : > { %v604_v53 = vadd.f32 %v1536_v44, %v2062_v56  ;;  %v1507_v56 = vsel %vm335_vm2, 1.0, %v1848_v51  ;;  %v1557_v38 = vsel %vm673_vm14, 1.0, %v1848_v51  ;;  %v1766_v44 = vld [vmem:[%s2434_s4 + $0x10] sm:$0xff]  }
 0x107   : > { %v533_v28 = vpop.permute.xlu1 %532 }
 0x108   : > { %vm557_vm13 = vcmp.eq.s32.totalorder %v2046_v48, %v533_v28 }
 0x109   : > { %v1537_v39 = vsel %vm557_vm13, 1.0, %v1848_v51 }
 0x10a   : > { %v605_v49 = vadd.f32 %v1537_v39, %v493_v41 }
 0x10c   : > { %v639_v40 = vpop.permute.xlu1 %638  ;;  %v717_v57 = vadd.f32 %v1553_v46, %v605_v49  ;;  %v1767_v46 = vld [vmem:[%s2434_s4 + $0x18] sm:$0xff]  }
 0x10d   : > { %vm667_vm0 = vcmp.eq.s32.totalorder %v2046_v48, %v639_v40 }
 0x10e   : > { %v1551_v45 = vsel %vm667_vm0, 1.0, %v1848_v51  ;;  %vm922_vm0 = vcmask 261120  }
 0x10f   : > { %v715_v50 = vadd.f32 %v1551_v45, %v603_v43 }
 0x110   : > { %v642_v52 = vpop.permute.xlu1 %641 }
 0x111   : > { %vm668_vm1 = vcmp.eq.s32.totalorder %v2046_v48, %v642_v52  ;;  %v726_v54 = vpack.c.bf16 %v715_v50, %v714_v47  ;;  %v1768_v52 = vld [vmem:[%s2434_s4 + $0x20] sm:$0xff]  }
 0x112   : > { %v1552_v55 = vsel %vm668_vm1, 1.0, %v1848_v51  ;;  %vm1236_vm1 = vcmp.lt.s32.totalorder %v2046_v48, 49 }
 0x113   : > { %v716_v58 = vadd.f32 %v1552_v55, %v604_v53  ;;  %1654 = vmatprep.mubr.bf16.mxu0 %v726_v54  ;;  %v1769_v53 = vld [vmem:[%s2434_s4 + $0x28] sm:$0xff]  }
 0x115   : > { %v312_v59 = vpop.permute.xlu1 %311  ;;  %v727_v60 = vpack.c.bf16 %v717_v57, %v716_v58 }
 0x116   : > { %vm334_vm6 = vcmp.eq.s32.totalorder %v2046_v48, %v312_v59 }
 0x117   : > { %1655 = vmatmul.mubr.bf16.gmra.mrb[8].mxu0 %v727_v60  ;;  %v1506_v10 = vsel %vm334_vm6, 1.0, %v1848_v51 }
 0x11a   : > { %v424_v62 = vpop.permute.xlu1 %423 }
 0x11b   : > { %vm446_vm5 = vcmp.eq.s32.totalorder %v2046_v48, %v424_v62  ;;  %v1770_v62 = vld [vmem:[%s2434_s4 + $0x30] sm:$0xff]  }
 0x11c   : > { %v1522_v12 = vsel %vm446_vm5, 1.0, %v1848_v51 }
 0x11d   : > { %v494_v14 = vadd.f32 %v1522_v12, %v1506_v10 }
 0x11e   : > { %v427_v63 = vpop.permute.xlu1 %426 }
 0x11f   : > { %vm447_vm4 = vcmp.eq.s32.totalorder %v2046_v48, %v427_v63  ;;  %v1771_v63 = vld [vmem:[%s2434_s4 + $0x38] sm:$0xff]  }
 0x120   : > { %v1523_v0 = vsel %vm447_vm4, 1.0, %v1848_v51 }
 0x121   : > { %v495_v1 = vadd.f32 %v1523_v0, %v1507_v56 }
 0x123   : > { %v321_v4 = vpop.permute.xlu1 %320  ;;  %v607_v5 = vadd.f32 %v1539_v2, %v495_v1 }
 0x124   : > { %vm337_vm9 = vcmp.eq.s32.totalorder %v2046_v48, %v321_v4 }
 0x125   : > { %v1509_v18 = vsel %vm337_vm9, 1.0, %v1848_v51 }
 0x128   : > { %v433_v6 = vpop.permute.xlu1 %432 }
 0x129   : > { %vm449_vm8 = vcmp.eq.s32.totalorder %v2046_v48, %v433_v6  ;;  %v1566_v6 = vld [vmem:[%s2433_s3] ss:$0 sm:$0xff] }
 0x12a   : > { %v1525_v15 = vsel %vm449_vm8, 1.0, %v1848_v51 }
 0x12b   : > { %v497_v21 = vadd.f32 %v1525_v15, %v1509_v18 }
 0x12d   : > { %v536_v7 = vpop.permute.xlu1 %535 }
 0x12e   : > { %vm558_vm7 = vcmp.eq.s32.totalorder %v2046_v48, %v536_v7 }
 0x12f   : > { %v1538_v11 = vsel %vm558_vm7, 1.0, %v1848_v51 }
 0x130   : > { %v606_v16 = vadd.f32 %v1538_v11, %v494_v14 }
 0x131   : > { %v542_v42 = vpop.permute.xlu1 %541 }
 0x132   : > { %vm560_vm12 = vcmp.eq.s32.totalorder %v2046_v48, %v542_v42  ;;  %v718_v25 = vadd.f32 %v1554_v22, %v606_v16 }
 0x133   : > { %v1540_v23 = vsel %vm560_vm12, 1.0, %v1848_v51 }
 0x134   : > { %v608_v29 = vadd.f32 %v1540_v23, %v2069_v61 }
 0x135   : > { %v545_v9 = vpop.permute.xlu1 %544 }
 0x136   : > { %vm561_vm10 = vcmp.eq.s32.totalorder %v2046_v48, %v545_v9 }
 0x137   : > { %v1541_v19 = vsel %vm561_vm10, 1.0, %v1848_v51 }
 0x138   : > { %v609_v26 = vadd.f32 %v1541_v19, %v497_v21 }
 0x13a   : > { %v651_v20 = vpop.permute.xlu1 %650  ;;  %v721_v32 = vadd.f32 %v1557_v38, %v609_v26 }
 0x13b   : > { %vm671_vm13 = vcmp.eq.s32.totalorder %v2046_v48, %v651_v20 }
 0x13c   : > { %v1555_v24 = vsel %vm671_vm13, 1.0, %v1848_v51 }
 0x13d   : > { %v719_v27 = vadd.f32 %v1555_v24, %v607_v5 }
 0x13e   : > { %v654_v28 = vpop.permute.xlu1 %653 }
 0x13f   : > { %vm672_vm15 = vcmp.eq.s32.totalorder %v2046_v48, %v654_v28  ;;  %v728_v30 = vpack.c.bf16 %v719_v27, %v718_v25 }
 0x140   : > { %v1556_v31 = vsel %vm672_vm15, 1.0, %v1848_v51  ;;  %v1765_v51 = vld [vmem:[%s2434_s4 + $0x8] sm:$0xff]  }
 0x141   : > { %v720_v33 = vadd.f32 %v1556_v31, %v608_v29  ;;  %1658 = vmatprep.mubr.bf16.mxu0 %v728_v30 }
 0x143   : > { %v729_v3 = vpack.c.bf16 %v721_v32, %v720_v33 }
 0x145   : > { %1659 = vmatmul.mubr.bf16.gmra.mrb[12].mxu0 %v729_v3 }
 0x1b5   : > { %v1648_v35 = vpop.f32.mrb[0].mxu0 }
 0x1b6   : > { %v828_v36 = vpop.f32.mrb[1].mxu0 }
 0x1b7   : > { %v1649_v61 = vpop.f32.mrb[2].mxu0 }
 0x1b8   : > { %v892_v37 = vpack.c.bf16 %v1649_v61, %v1648_v35  ;;  %v831_v39 = vpop.f32.mrb[3].mxu0 }
 0x1b9   : > { %v891_v40 = vpack.c.bf16 %v831_v39, %v828_v36 }
 0x1bb   : > { %1666 = vmatprep.mubr.msk.bf16.mxu1 %vm922_vm0, %v891_v40 }
 0x1bc   : > { %1667 = vmatmul.mubr.msk.bf16.vlgmr.msra.gmra.mrb[0].mxu1 %vm922_vm0, %v892_v37 }
 0x1bd   : > { %v1652_v41 = vpop.f32.mrb[4].mxu0  ;;  %1683 = vmatpush3.bf16.msra.mxu1 %v1764_v34 }
 0x1be   : > { %v844_v43 = vpop.f32.mrb[5].mxu0  ;;  %1684 = vmatprep.subr.bf16.mxu1 %v1765_v51 }
 0x1bf   : > { %v1653_v45 = vpop.f32.mrb[6].mxu0 }
 0x1c0   : > { %v894_v47 = vpack.c.bf16 %v1653_v45, %v1652_v41  ;;  %v847_v49 = vpop.f32.mrb[7].mxu0 }
 0x1c1   : > { %v893_v50 = vpack.c.bf16 %v847_v49, %v844_v43  ;;  %1685 = vmatpush3.bf16.msra.mxu1 %v1765_v51 }
 0x1c2   : > { %1686 = vmatprep.subr.bf16.mxu1 %v1766_v44 }
 0x1c3   : > { %1670 = vmatprep.mubr.msk.bf16.mxu1 %vm922_vm0, %v893_v50 }
 0x1c4   : > { %1671 = vmatmul.mubr.msk.bf16.gmra.mrb[4].mxu1 %vm922_vm0, %v894_v47 }
 0x1c5   : > { %1687 = vmatpush3.bf16.msra.mxu1 %v1766_v44 }
 0x1c6   : > { %1688 = vmatprep.subr.bf16.mxu1 %v1767_v46 }
 0x1c9   : > { %1689 = vmatpush3.bf16.msra.mxu1 %v1767_v46 }
 0x1ca   : > { %1690 = vmatprep.subr.bf16.mxu1 %v1768_v52 }
 0x1cd   : > { %1691 = vmatpush3.bf16.msra.mxu1 %v1768_v52 }
 0x1ce   : > { %1692 = vmatprep.subr.bf16.mxu1 %v1769_v53 }
 0x1d1   : > { %1693 = vmatpush3.bf16.msra.mxu1 %v1769_v53 }
 0x1d2   : > { %1694 = vmatprep.subr.bf16.mxu1 %v1770_v62 }
 0x1d5   : > { %1695 = vmatpush3.bf16.msra.mxu1 %v1770_v62 }
 0x1d6   : > { %1696 = vmatprep.subr.bf16.mxu1 %v1771_v63 }
 0x1d9   : > { %1697 = vmatpush3.bf16.msra.mxu1 %v1771_v63 }
 0x1ea   : > { %v1656_v54 = vpop.f32.mrb[8].mxu0 }
 0x1eb   : > { %v860_v55 = vpop.f32.mrb[9].mxu0 }
 0x1ec   : > { %v1657_v57 = vpop.f32.mrb[10].mxu0 }
 0x1ed   : > { %v896_v58 = vpack.c.bf16 %v1657_v57, %v1656_v54  ;;  %v863_v59 = vpop.f32.mrb[11].mxu0 }
 0x1ee   : > { %v895_v60 = vpack.c.bf16 %v863_v59, %v860_v55 }
 0x1f0   : > { %1674 = vmatprep.mubr.msk.bf16.mxu1 %vm922_vm0, %v895_v60 }
 0x1f1   : > { %1675 = vmatmul.mubr.msk.bf16.gmra.mrb[8].mxu1 %vm922_vm0, %v896_v58 }
 0x218   : > { %v1660_v56 = vpop.f32.mrb[12].mxu0 }
 0x219   : > { %v876_v0 = vpop.f32.mrb[13].mxu0 }
 0x21a   : > { %v1661_v1 = vpop.f32.mrb[14].mxu0 }
 0x21b   : > { %v898_v2 = vpack.c.bf16 %v1661_v1, %v1660_v56  ;;  %v879_v4 = vpop.f32.mrb[15].mxu0  ;;  %v1577_v56 = vld [vmem:[%s2435_s5] ss:$0 sm:$0xff] }
 0x21c   : > { %v897_v5 = vpack.c.bf16 %v879_v4, %v876_v0 }
 0x21e   : > { %1678 = vmatprep.mubr.msk.bf16.mxu1 %vm922_vm0, %v897_v5 }
 0x21f   : > { %1679 = vmatmul.mubr.msk.bf16.gmra.mrb[12].mxu1 %vm922_vm0, %v898_v2 }
 0x28f   : > { %v1668_v7 = vpop.f32.mrb[0].mxu1 }
 0x290   : > { %v990_v42 = vadd.f32 %v1668_v7, %v1566_v6  ;;  %v981_v12 = vpop.f32.mrb[1].mxu1 }
 0x291   : > { %v982_v8 = vadd.f32 %v1566_v6, %v981_v12  ;;  %v1669_v9 = vpop.f32.mrb[2].mxu1 }
 0x292   : > { %v993_v10 = vadd.f32 %v1669_v9, %v1566_v6  ;;  %v984_v11 = vpop.f32.mrb[3].mxu1  ;;  %v1046_v14 = vmax.f32 %v990_v42, 0.0 }
 0x293   : > { %v985_v13 = vadd.f32 %v1566_v6, %v984_v11  ;;  %v1044_v16 = vmax.f32 %v982_v8, 0.0 }
 0x294   : > { %v1047_v15 = vmax.f32 %v993_v10, 0.0 }
 0x295   : > { %v1045_v17 = vmax.f32 %v985_v13, 0.0 }
 0x296   : > { %v1061_v18 = vpack.c.bf16 %v1047_v15, %v1046_v14 }
 0x297   : > { %v1060_v19 = vpack.c.bf16 %v1045_v17, %v1044_v16  ;;  %v1672_v20 = vpop.f32.mrb[4].mxu1 }
 0x298   : > { %v1006_v21 = vadd.f32 %v1672_v20, %v1566_v6  ;;  %v997_v22 = vpop.f32.mrb[5].mxu1 }
 0x299   : > { %v998_v23 = vadd.f32 %v1566_v6, %v997_v22  ;;  %v1673_v24 = vpop.f32.mrb[6].mxu1  ;;  %1698 = vmatprep.mubr.bf16.mxu1 %v1060_v19 }
 0x29a   : > { %v1009_v25 = vadd.f32 %v1673_v24, %v1566_v6  ;;  %v1000_v26 = vpop.f32.mrb[7].mxu1  ;;  %1699 = vmatmul.mubr.bf16.vlgmr.msra.gmra.mrb[16].mxu1 %v1061_v18  ;;  %v1050_v28 = vmax.f32 %v1006_v21, 0.0 }
 0x29b   : > { %v1001_v27 = vadd.f32 %v1566_v6, %v1000_v26  ;;  %v1048_v30 = vmax.f32 %v998_v23, 0.0 }
 0x29c   : > { %v1051_v29 = vmax.f32 %v1009_v25, 0.0 }
 0x29d   : > { %v1049_v38 = vmax.f32 %v1001_v27, 0.0 }
 0x29e   : > { %v1063_v31 = vpack.c.bf16 %v1051_v29, %v1050_v28 }
 0x29f   : > { %v1062_v32 = vpack.c.bf16 %v1049_v38, %v1048_v30 }
 0x2a1   : > { %1702 = vmatprep.mubr.bf16.mxu1 %v1062_v32 }
 0x2a2   : > { %1703 = vmatmul.mubr.bf16.gmra.mrb[20].mxu1 %v1063_v31 }
 0x2c4   : > { %v1676_v33 = vpop.f32.mrb[8].mxu1 }
 0x2c5   : > { %v1022_v3 = vadd.f32 %v1676_v33, %v1566_v6  ;;  %v1013_v34 = vpop.f32.mrb[9].mxu1 }
 0x2c6   : > { %v1014_v35 = vadd.f32 %v1566_v6, %v1013_v34  ;;  %v1677_v36 = vpop.f32.mrb[10].mxu1 }
 0x2c7   : > { %v1025_v61 = vadd.f32 %v1677_v36, %v1566_v6  ;;  %v1016_v37 = vpop.f32.mrb[11].mxu1  ;;  %v1054_v40 = vmax.f32 %v1022_v3, 0.0 }
 0x2c8   : > { %v1017_v39 = vadd.f32 %v1566_v6, %v1016_v37  ;;  %v1052_v41 = vmax.f32 %v1014_v35, 0.0 }
 0x2c9   : > { %v1055_v51 = vmax.f32 %v1025_v61, 0.0 }
 0x2ca   : > { %v1053_v43 = vmax.f32 %v1017_v39, 0.0 }
 0x2cb   : > { %v1065_v44 = vpack.c.bf16 %v1055_v51, %v1054_v40 }
 0x2cc   : > { %v1064_v45 = vpack.c.bf16 %v1053_v43, %v1052_v41 }
 0x2ce   : > { %1706 = vmatprep.mubr.bf16.mxu1 %v1064_v45 }
 0x2cf   : > { %1707 = vmatmul.mubr.bf16.gmra.mrb[24].mxu1 %v1065_v44 }
 0x2f2   : > { %v1680_v47 = vpop.f32.mrb[12].mxu1 }
 0x2f3   : > { %v1038_v49 = vadd.f32 %v1680_v47, %v1566_v6  ;;  %v1029_v50 = vpop.f32.mrb[13].mxu1 }
 0x2f4   : > { %v1030_v46 = vadd.f32 %v1566_v6, %v1029_v50  ;;  %v1681_v52 = vpop.f32.mrb[14].mxu1 }
 0x2f5   : > { %v1041_v53 = vadd.f32 %v1681_v52, %v1566_v6  ;;  %v1032_v54 = vpop.f32.mrb[15].mxu1  ;;  %v1058_v57 = vmax.f32 %v1038_v49, 0.0 }
 0x2f6   : > { %v1033_v55 = vadd.f32 %v1566_v6, %v1032_v54  ;;  %v1056_v59 = vmax.f32 %v1030_v46, 0.0 }
 0x2f7   : > { %v1059_v58 = vmax.f32 %v1041_v53, 0.0 }
 0x2f8   : > { %v1057_v60 = vmax.f32 %v1033_v55, 0.0 }
 0x2f9   : > { %v1067_v62 = vpack.c.bf16 %v1059_v58, %v1058_v57 }
 0x2fa   : > { %v1066_v63 = vpack.c.bf16 %v1057_v60, %v1056_v59 }
 0x2fc   : > { %1710 = vmatprep.mubr.bf16.mxu1 %v1066_v63 }
 0x2fd   : > { %1711 = vmatmul.mubr.bf16.gmra.mrb[28].mxu1 %v1067_v62 }
 0x36d   : > { %v1700_v0 = vpop.f32.mrb[16].mxu1 }
 0x36e   : > { %v1182_v1 = vadd.f32 %v1700_v0, %v1577_v56  ;;  %v1173_v2 = vpop.f32.mrb[17].mxu1 }
 0x36f   : > { %v1174_v4 = vadd.f32 %v1577_v56, %v1173_v2  ;;  %v1701_v5 = vpop.f32.mrb[18].mxu1 }
 0x370   : > { %v1176_v6 = vpop.f32.mrb[19].mxu1  ;;  %v1239_v7 = vsel %vm1236_vm1, %v1182_v1, -1e+30  ;;  %v1185_v42 = vadd.f32 %v1701_v5, %v1577_v56 }
 0x371   : > { %v1177_v12 = vadd.f32 %v1577_v56, %v1176_v6  ;;  %1257 = vmax.xlane.f32.xlu0 %v1239_v7  ;;  %v1237_v8 = vsel %vm1236_vm1, %v1174_v4, -1e+30 }
 0x372   : > { %1253 = vmax.xlane.f32.xlu1 %v1237_v8  ;;  %v1240_v11 = vsel %vm1236_vm1, %v1185_v42, -1e+30 }
 0x373   : > { %v1238_v9 = vsel %vm1236_vm1, %v1177_v12, -1e+30 }
 0x375   : > { %v1704_v10 = vpop.f32.mrb[20].mxu1  ;;  %1255 = vmax.xlane.f32.xlu0 %v1238_v9 }
 0x376   : > { %v1198_v13 = vadd.f32 %v1704_v10, %v1577_v56  ;;  %v1189_v14 = vpop.f32.mrb[21].mxu1  ;;  %1259 = vmax.xlane.f32.xlu1 %v1240_v11 }
 0x377   : > { %v1705_v15 = vpop.f32.mrb[22].mxu1  ;;  %v1190_v16 = vadd.f32 %v1577_v56, %v1189_v14 }
 0x378   : > { %v1201_v17 = vadd.f32 %v1705_v15, %v1577_v56  ;;  %v1192_v18 = vpop.f32.mrb[23].mxu1  ;;  %v1243_v19 = vsel %vm1236_vm1, %v1198_v13, -1e+30 }
 0x379   : > { %1265 = vmax.xlane.f32.xlu0 %v1243_v19  ;;  %v1193_v20 = vadd.f32 %v1577_v56, %v1192_v18  ;;  %v1241_v22 = vsel %vm1236_vm1, %v1190_v16, -1e+30 }
 0x37a   : > { %v1244_v21 = vsel %vm1236_vm1, %v1201_v17, -1e+30 }
 0x37b   : > { %1267 = vmax.xlane.f32.xlu1 %v1244_v21  ;;  %v1242_v23 = vsel %vm1236_vm1, %v1193_v20, -1e+30 }
 0x37d   : > { %1261 = vmax.xlane.f32.xlu0 %v1241_v22 }
 0x37f   : > { %1263 = vmax.xlane.f32.xlu1 %v1242_v23 }
 0x3a2   : > { %v1708_v24 = vpop.f32.mrb[24].mxu1 }
 0x3a3   : > { %v1214_v25 = vadd.f32 %v1708_v24, %v1577_v56  ;;  %v1205_v26 = vpop.f32.mrb[25].mxu1 }
 0x3a4   : > { %v1709_v27 = vpop.f32.mrb[26].mxu1  ;;  %v1206_v28 = vadd.f32 %v1577_v56, %v1205_v26 }
 0x3a5   : > { %v1217_v29 = vadd.f32 %v1709_v27, %v1577_v56  ;;  %v1208_v30 = vpop.f32.mrb[27].mxu1  ;;  %v2294_v38 = vsel %vm1236_vm1, %v1214_v25, -1e+30 }
 0x3a6   : > { %1273 = vmax.xlane.f32.xlu0 %v2294_v38  ;;  %v1209_v31 = vadd.f32 %v1577_v56, %v1208_v30  ;;  %v2304_v33 = vsel %vm1236_vm1, %v1206_v28, -1e+30 }
 0x3a7   : > { %v2299_v32 = vsel %vm1236_vm1, %v1217_v29, -1e+30 }
 0x3a8   : > { %1275 = vmax.xlane.f32.xlu1 %v2299_v32  ;;  %v2309_v3 = vsel %vm1236_vm1, %v1209_v31, -1e+30 }
 0x3aa   : > { %1269 = vmax.xlane.f32.xlu0 %v2304_v33 }
 0x3ac   : > { %1271 = vmax.xlane.f32.xlu1 %v2309_v3 }
 0x3d0   : > { %v1712_v34 = vpop.f32.mrb[28].mxu1 }
 0x3d1   : > { %v1221_v35 = vpop.f32.mrb[29].mxu1  ;;  %v1230_v39 = vadd.f32 %v1712_v34, %v1577_v56 }
 0x3d2   : > { %v1222_v36 = vadd.f32 %v1577_v56, %v1221_v35  ;;  %v1713_v61 = vpop.f32.mrb[30].mxu1 }
 0x3d3   : > { %v1224_v37 = vpop.f32.mrb[31].mxu1  ;;  %v1233_v41 = vadd.f32 %v1713_v61, %v1577_v56  ;;  %v2324_v44 = vsel %vm1236_vm1, %v1230_v39, -1e+30 }
 0x3d4   : > { %v1225_v40 = vadd.f32 %v1577_v56, %v1224_v37  ;;  %v2314_v51 = vsel %vm1236_vm1, %v1222_v36, -1e+30 }
 0x3d5   : > { %1277 = vmax.xlane.f32.xlu0 %v2314_v51  ;;  %v2329_v45 = vsel %vm1236_vm1, %v1233_v41, -1e+30 }
 0x3d6   : > { %v2319_v43 = vsel %vm1236_vm1, %v1225_v40, -1e+30 }
 0x3d7   : > { %1279 = vmax.xlane.f32.xlu1 %v2319_v43 }
 0x3d9   : > { %1281 = vmax.xlane.f32.xlu0 %v2324_v44 }
 0x3db   : > { %1283 = vmax.xlane.f32.xlu1 %v2329_v45 }
 0x3fe   : > { %v1258_v47 = vpop.xlane.xlu0 %1257 }
 0x3ff   : > { %v2332_v49 = vsub.f32 %v1239_v7, %v1258_v47  ;;  %v1254_v50 = vpop.xlane.xlu1 %1253 }
 0x400   : > { %v2334_v46 = vsub.f32 %v1237_v8, %v1254_v50 }
 0x401   : > { %v1305_v52 = vmul.f32 1.442695, %v2332_v49 }
 0x402   : > { %v1256_v53 = vpop.xlane.xlu0 %1255  ;;  %v1301_v54 = vmul.f32 1.442695, %v2334_v46 }
 0x403   : > { %1772 = vpow2.f32 %v1305_v52  ;;  %v1260_v55 = vpop.xlane.xlu1 %1259  ;;  %v2338_v57 = vsub.f32 %v1238_v9, %v1256_v53 }
 0x404   : > { %v2340_v48 = vsub.f32 %v1240_v11, %v1260_v55  ;;  %1774 = vpow2.f32 %v1301_v54 }
 0x405   : > { %v1303_v62 = vmul.f32 1.442695, %v2338_v57 }
 0x406   : > { %v1307_v58 = vmul.f32 1.442695, %v2340_v48  ;;  %v1266_v59 = vpop.xlane.xlu0 %1265 }
 0x407   : > { %v2343_v60 = vsub.f32 %v1243_v19, %v1266_v59 }
 0x408   : > { %1776 = vpow2.f32 %v1307_v58  ;;  %v1268_v63 = vpop.xlane.xlu1 %1267 }
 0x409   : > { %v1313_v56 = vmul.f32 1.442695, %v2343_v60  ;;  %v2347_v0 = vsub.f32 %v1244_v21, %v1268_v63 }
 0x40a   : > { %v1262_v1 = vpop.xlane.xlu0 %1261 }
 0x40b   : > { %1778 = vpow2.f32 %v1313_v56  ;;  %v2349_v2 = vsub.f32 %v1241_v22, %v1262_v1  ;;  %v1315_v4 = vmul.f32 1.442695, %v2347_v0 }
 0x40c   : > { %1780 = vpow2.f32 %v1303_v62  ;;  %v1264_v5 = vpop.xlane.xlu1 %1263 }
 0x40d   : > { %v1773_v6 = vpop.eup %1772  ;;  %v1309_v7 = vmul.f32 1.442695, %v2349_v2  ;;  %v2353_v42 = vsub.f32 %v1242_v23, %v1264_v5 }
 0x40e   : > { %1337 = vadd.xlane.f32.xlu0 %v1773_v6  ;;  %v1775_v8 = vpop.eup %1774 }
 0x40f   : > { %1782 = vpow2.f32 %v1309_v7  ;;  %v1311_v12 = vmul.f32 1.442695, %v2353_v42 }
 0x410   : > { %1784 = vpow2.f32 %v1315_v4 }
 0x411   : > { %1786 = vpow2.f32 %v1311_v12 }
 0x412   : > { %v1777_v9 = vpop.eup %1776  ;;  %1333 = vadd.xlane.f32.xlu0 %v1775_v8 }
 0x413   : > { %1339 = vadd.xlane.f32.xlu1 %v1777_v9 }
 0x415   : > { %v1779_v10 = vpop.eup %1778 }
 0x416   : > { %v1781_v11 = vpop.eup %1780  ;;  %1345 = vadd.xlane.f32.xlu0 %v1779_v10 }
 0x417   : > { %1335 = vadd.xlane.f32.xlu1 %v1781_v11 }
 0x419   : > { %v1783_v13 = vpop.eup %1782 }
 0x41a   : > { %v1785_v14 = vpop.eup %1784  ;;  %1341 = vadd.xlane.f32.xlu0 %v1783_v13 }
 0x41b   : > { %1347 = vadd.xlane.f32.xlu1 %v1785_v14  ;;  %v1787_v15 = vpop.eup %1786 }
 0x41f   : > { %1343 = vadd.xlane.f32.xlu1 %v1787_v15 }
 0x433   : > { %v1274_v16 = vpop.xlane.xlu0 %1273 }
 0x434   : > { %v2357_v17 = vsub.f32 %v2294_v38, %v1274_v16 }
 0x435   : > { %v1276_v18 = vpop.xlane.xlu1 %1275 }
 0x436   : > { %v1321_v19 = vmul.f32 1.442695, %v2357_v17  ;;  %v2361_v20 = vsub.f32 %v2299_v32, %v1276_v18 }
 0x437   : > { %v1270_v21 = vpop.xlane.xlu0 %1269 }
 0x438   : > { %1788 = vpow2.f32 %v1321_v19  ;;  %v1323_v22 = vmul.f32 1.442695, %v2361_v20  ;;  %v2365_v23 = vsub.f32 %v2304_v33, %v1270_v21 }
 0x439   : > { %v1272_v24 = vpop.xlane.xlu1 %1271 }
 0x43a   : > { %1790 = vpow2.f32 %v1323_v22  ;;  %v1317_v25 = vmul.f32 1.442695, %v2365_v23  ;;  %v2369_v26 = vsub.f32 %v2309_v3, %v1272_v24 }
 0x43c   : > { %1792 = vpow2.f32 %v1317_v25  ;;  %v1319_v27 = vmul.f32 1.442695, %v2369_v26 }
 0x43e   : > { %1794 = vpow2.f32 %v1319_v27 }
 0x442   : > { %v1789_v28 = vpop.eup %1788 }
 0x443   : > { %1353 = vadd.xlane.f32.xlu0 %v1789_v28 }
 0x444   : > { %v1791_v29 = vpop.eup %1790 }
 0x445   : > { %1355 = vadd.xlane.f32.xlu1 %v1791_v29 }
 0x446   : > { %v1793_v30 = vpop.eup %1792 }
 0x447   : > { %1349 = vadd.xlane.f32.xlu0 %v1793_v30 }
 0x448   : > { %v1795_v38 = vpop.eup %1794 }
 0x449   : > { %1351 = vadd.xlane.f32.xlu1 %v1795_v38 }
 0x462   : > { %v1278_v31 = vpop.xlane.xlu0 %1277 }
 0x463   : > { %v2373_v32 = vsub.f32 %v2314_v51, %v1278_v31 }
 0x464   : > { %v1280_v33 = vpop.xlane.xlu1 %1279 }
 0x465   : > { %v1325_v3 = vmul.f32 1.442695, %v2373_v32  ;;  %v2377_v34 = vsub.f32 %v2319_v43, %v1280_v33 }
 0x466   : > { %v1282_v35 = vpop.xlane.xlu0 %1281 }
 0x467   : > { %1796 = vpow2.f32 %v1325_v3  ;;  %v1327_v36 = vmul.f32 1.442695, %v2377_v34  ;;  %v2381_v61 = vsub.f32 %v2324_v44, %v1282_v35 }
 0x468   : > { %v1284_v37 = vpop.xlane.xlu1 %1283 }
 0x469   : > { %1798 = vpow2.f32 %v1327_v36  ;;  %v1329_v39 = vmul.f32 1.442695, %v2381_v61  ;;  %v2385_v40 = vsub.f32 %v2329_v45, %v1284_v37 }
 0x46b   : > { %1800 = vpow2.f32 %v1329_v39  ;;  %v1331_v51 = vmul.f32 1.442695, %v2385_v40 }
 0x46d   : > { %1802 = vpow2.f32 %v1331_v51 }
 0x471   : > { %v1797_v41 = vpop.eup %1796 }
 0x472   : > { %1357 = vadd.xlane.f32.xlu0 %v1797_v41 }
 0x473   : > { %v1799_v43 = vpop.eup %1798 }
 0x474   : > { %1359 = vadd.xlane.f32.xlu1 %v1799_v43 }
 0x475   : > { %v1801_v47 = vpop.eup %1800 }
 0x476   : > { %1361 = vadd.xlane.f32.xlu0 %v1801_v47 }
 0x477   : > { %v1803_v44 = vpop.eup %1802 }
 0x478   : > { %1363 = vadd.xlane.f32.xlu1 %v1803_v44 }
 0x49b   : > { %v1338_v50 = vpop.xlane.xlu0 %1337 }
 0x49c   : > { %1804 = vlog2.f32 %v1338_v50 }
 0x49f   : > { %v1334_v52 = vpop.xlane.xlu0 %1333 }
 0x4a0   : > { %1806 = vlog2.f32 %v1334_v52  ;;  %v1340_v53 = vpop.xlane.xlu1 %1339 }
 0x4a1   : > { %1808 = vlog2.f32 %v1340_v53 }
 0x4a3   : > { %v1346_v45 = vpop.xlane.xlu0 %1345 }
 0x4a4   : > { %1810 = vlog2.f32 %v1346_v45  ;;  %v1336_v54 = vpop.xlane.xlu1 %1335 }
 0x4a5   : > { %1812 = vlog2.f32 %v1336_v54 }
 0x4a6   : > { %v1805_v55 = vpop.eup %1804 }
 0x4a7   : > { %v1370_v58 = vmul.f32 0.6931472, %v1805_v55  ;;  %v1342_v59 = vpop.xlane.xlu0 %1341 }
 0x4a8   : > { %1814 = vlog2.f32 %v1342_v59  ;;  %v1348_v62 = vpop.xlane.xlu1 %1347 }
 0x4a9   : > { %v1399_v63 = vsub.f32 %v2332_v49, %v1370_v58  ;;  %1816 = vlog2.f32 %v1348_v62 }
 0x4aa   : > { %v1807_v56 = vpop.eup %1806 }
 0x4ab   : > { %v1809_v1 = vpop.eup %1808  ;;  %1415 = vst [vmem:[%s2393_s28 + $0x10] sm:$0xff] %v1399_v63  ;;  %v1366_v4 = vmul.f32 0.6931472, %v1807_v56 }
 0x4ac   : > { %v1372_v5 = vmul.f32 0.6931472, %v1809_v1  ;;  %v1344_v6 = vpop.xlane.xlu1 %1343 }
 0x4ad   : > { %v1397_v7 = vsub.f32 %v2334_v46, %v1366_v4  ;;  %1818 = vlog2.f32 %v1344_v6 }
 0x4ae   : > { %v1811_v12 = vpop.eup %1810  ;;  %v1400_v8 = vsub.f32 %v2340_v48, %v1372_v5 }
 0x4af   : > { %v1813_v9 = vpop.eup %1812  ;;  %1413 = vst [vmem:[%s2393_s28] sm:$0xff] %v1397_v7  ;;  %v1378_v49 = vmul.f32 0.6931472, %v1811_v12 }
 0x4b0   : > { %1416 = vst [vmem:[%s2393_s28 + $0x18] sm:$0xff] %v1400_v8  ;;  %v1368_v10 = vmul.f32 0.6931472, %v1813_v9 }
 0x4b1   : > { %v1403_v11 = vsub.f32 %v2343_v60, %v1378_v49 }
 0x4b2   : > { %v1815_v13 = vpop.eup %1814  ;;  %v1398_v14 = vsub.f32 %v2338_v57, %v1368_v10 }
 0x4b3   : > { %v1817_v15 = vpop.eup %1816  ;;  %1419 = vst [vmem:[%s2393_s28 + $0x30] sm:$0xff] %v1403_v11  ;;  %v1374_v46 = vmul.f32 0.6931472, %v1815_v13 }
 0x4b4   : > { %1414 = vst [vmem:[%s2393_s28 + $0x8] sm:$0xff] %v1398_v14  ;;  %v1380_v16 = vmul.f32 0.6931472, %v1817_v15 }
 0x4b5   : > { %v1401_v48 = vsub.f32 %v2349_v2, %v1374_v46 }
 0x4b6   : > { %v1404_v18 = vsub.f32 %v2347_v0, %v1380_v16 }
 0x4b7   : > { %v1819_v19 = vpop.eup %1818  ;;  %1417 = vst [vmem:[%s2393_s28 + $0x20] sm:$0xff] %v1401_v48 }
 0x4b8   : > { %1420 = vst [vmem:[%s2393_s28 + $0x38] sm:$0xff] %v1404_v18  ;;  %v1376_v21 = vmul.f32 0.6931472, %v1819_v19 }
 0x4ba   : > { %v1402_v22 = vsub.f32 %v2353_v42, %v1376_v21 }
 0x4bc   : > { %1418 = vst [vmem:[%s2393_s28 + $0x28] sm:$0xff] %v1402_v22 }
 0x4d0   : > { %v1354_v60 = vpop.xlane.xlu0 %1353 }
 0x4d1   : > { %1820 = vlog2.f32 %v1354_v60 }
 0x4d2   : > { %v1356_v57 = vpop.xlane.xlu1 %1355 }
 0x4d3   : > { %1822 = vlog2.f32 %v1356_v57 }
 0x4d4   : > { %v1350_v24 = vpop.xlane.xlu0 %1349 }
 0x4d5   : > { %1824 = vlog2.f32 %v1350_v24 }
 0x4d6   : > { %v1352_v25 = vpop.xlane.xlu1 %1351 }
 0x4d7   : > { %1826 = vlog2.f32 %v1352_v25 }
 0x4db   : > { %v1821_v0 = vpop.eup %1820 }
 0x4dc   : > { %v1386_v2 = vmul.f32 0.6931472, %v1821_v0 }
 0x4dd   : > { %v1823_v27 = vpop.eup %1822 }
 0x4de   : > { %v1407_v28 = vsub.f32 %v2357_v17, %v1386_v2  ;;  %v1388_v29 = vmul.f32 0.6931472, %v1823_v27 }
 0x4df   : > { %v1825_v42 = vpop.eup %1824 }
 0x4e0   : > { %1423 = vst [vmem:[%s2393_s28 + $0x50] sm:$0xff] %v1407_v28  ;;  %v1408_v30 = vsub.f32 %v2361_v20, %v1388_v29  ;;  %v1382_v38 = vmul.f32 0.6931472, %v1825_v42 }
 0x4e1   : > { %v1827_v31 = vpop.eup %1826 }
 0x4e2   : > { %1424 = vst [vmem:[%s2393_s28 + $0x58] sm:$0xff] %v1408_v30  ;;  %v1405_v33 = vsub.f32 %v2365_v23, %v1382_v38  ;;  %v1384_v3 = vmul.f32 0.6931472, %v1827_v31 }
 0x4e4   : > { %1421 = vst [vmem:[%s2393_s28 + $0x40] sm:$0xff] %v1405_v33  ;;  %v1406_v35 = vsub.f32 %v2369_v26, %v1384_v3 }
 0x4e6   : > { %1422 = vst [vmem:[%s2393_s28 + $0x48] sm:$0xff] %v1406_v35 }
 0x4ff   : > { %v1358_v36 = vpop.xlane.xlu0 %1357 }
 0x500   : > { %1828 = vlog2.f32 %v1358_v36 }
 0x501   : > { %v1360_v37 = vpop.xlane.xlu1 %1359 }
 0x502   : > { %1830 = vlog2.f32 %v1360_v37 }
 0x503   : > { %v1362_v17 = vpop.xlane.xlu0 %1361 }
 0x504   : > { %1832 = vlog2.f32 %v1362_v17 }
 0x505   : > { %v1364_v20 = vpop.xlane.xlu1 %1363 }
 0x506   : > { %1834 = vlog2.f32 %v1364_v20 }
 0x50a   : > { %v1829_v39 = vpop.eup %1828 }
 0x50b   : > { %v1390_v51 = vmul.f32 0.6931472, %v1829_v39 }
 0x50c   : > { %v1831_v23 = vpop.eup %1830 }
 0x50d   : > { %v1409_v41 = vsub.f32 %v2373_v32, %v1390_v51  ;;  %v1392_v43 = vmul.f32 0.6931472, %v1831_v23 }
 0x50e   : > { %v1833_v26 = vpop.eup %1832 }
 0x50f   : > { %1425 = vst [vmem:[%s2393_s28 + $0x60] sm:$0xff] %v1409_v41  ;;  %v1410_v47 = vsub.f32 %v2377_v34, %v1392_v43  ;;  %v1394_v44 = vmul.f32 0.6931472, %v1833_v26 }
 0x510   : > { %v1835_v50 = vpop.eup %1834 }
 0x511   : > { %1426 = vst [vmem:[%s2393_s28 + $0x68] sm:$0xff] %v1410_v47  ;;  %v1411_v52 = vsub.f32 %v2381_v61, %v1394_v44  ;;  %v1396_v53 = vmul.f32 0.6931472, %v1835_v50 }
 0x513   : > { %1427 = vst [vmem:[%s2393_s28 + $0x70] sm:$0xff] %v1411_v52  ;;  %v1412_v45 = vsub.f32 %v2385_v40, %v1396_v53 }
 0x515   : > { %1428 = vst [vmem:[%s2393_s28 + $0x78] sm:$0xff] %v1412_v45 }
 0x516 PF: > { %s16_s21 = sadd.s32 1, %s1842_s21  }
 0x517   : > { %p13_p4 = scmp.ge.s32.totalorder %s16_s21, 4  }
 0x519   :  { %15 = sbr.rel (!%p13_p4) target bundleno = 1 (0x1), region = 74 }

</bundles_post_ra>
